<compile_context>
chip_gen: v7x
topology: tpu7x:2x2x1
jax: 0.10.0
libtpu: 0.0.40
codegen_flags: <defaults>
</compile_context>

<pallas_src>
import jax
import jax.numpy as jnp
from jax.experimental import pallas as pl
from jax.experimental.pallas import tpu as pltpu


def _round_up(x, m):
    return ((x + m - 1) // m) * m


def _silu(y):
    # Single EUP transcendental (tanh) instead of sigmoid's exp + divide.
    return y * (0.5 * jnp.tanh(0.5 * y) + 0.5)


# ----------------------------------------------------------------------------
# Pallas kernel: fully fused backbone -> neck -> detector_head
# ----------------------------------------------------------------------------
def _fused_detector_kernel(p_ref, w1_ref, b1_ref, w2_ref, b2_ref, w3_ref, b3_ref, o_ref):
    """All operands transposed (channels x M-tile) so stores are lane-dense.

    p_ref : (K1, tm) bf16  im2col patches of the 3x3/s2 backbone conv (transposed)
    w1_ref: (C1, K1) bf16  backbone weights with BN scale folded in
    b1_ref: (C1, 1)  f32   folded BN bias
    w2_ref: (C2, C1) f32   neck 1x1 weights with BN scale folded in
    b2_ref: (C2, 1)  f32
    w3_ref: (C3, C2) f32   head 1x1 weights
    b3_ref: (C3, 1)  f32   head bias
    o_ref : (C3, tm)       predictions tile (lane dim = tm, multiple of 128)
    """
    # backbone conv (as bf16 MXU matmul) + folded-BN bias + SiLU; f32 accumulation
    y = jnp.dot(w1_ref[...], p_ref[...], preferred_element_type=jnp.float32)
    y = _silu(y + b1_ref[...])
    # neck 1x1 conv + folded-BN bias + SiLU — activations stay f32, never leave VMEM/vregs
    y = jnp.dot(w2_ref[...], y, preferred_element_type=jnp.float32)
    y = _silu(y + b2_ref[...])
    # detector head 1x1 conv + bias (no norm/act)
    y = jnp.dot(w3_ref[...], y, preferred_element_type=jnp.float32)
    o_ref[...] = (y + b3_ref[...]).astype(o_ref.dtype)


def _choose_tile(m_pad, tm_max=2048, min_tiles=2):
    """Largest multiple of 128 that divides m_pad, <= tm_max, keeping grid >= min_tiles
    when possible (so v7x's two TensorCores can both be used on the parallel axis)."""
    n128 = m_pad // 128
    best = 128
    for t in range(1, min(n128, tm_max // 128) + 1):
        if n128 % t:
            continue
        if (n128 // t) >= min(min_tiles, n128):
            best = max(best, t * 128)
    return best


def fused_detector_forward(patches_t, w1, b1, w2, b2, w3, b3, *,
                           tm_max=2048, out_dtype=jnp.float32):
    """patches_t: (K1, M) bf16; w*: (Cout, Cin_k); b*: (Cout,).  Returns (C3, M)."""
    K1, M = patches_t.shape
    C1, C2, C3 = w1.shape[0], w2.shape[0], w3.shape[0]

    # Pad M only to the lane width (128), not to tm -> no tm-sized padding blow-up.
    M_pad = _round_up(M, 128)
    if M_pad != M:
        patches_t = jnp.pad(patches_t, ((0, 0), (0, M_pad - M)))
    tm = _choose_tile(M_pad, tm_max=tm_max, min_tiles=2)
    grid = (M_pad // tm,)

    # bf16 patches/backbone weights feed the MXU; neck/head weights + biases stay f32.
    p_bf = patches_t.astype(jnp.bfloat16)
    w1b = w1.astype(jnp.bfloat16)
    w2f, w3f = w2.astype(jnp.float32), w3.astype(jnp.float32)
    b1c, b2c, b3c = (b.reshape(-1, 1).astype(jnp.float32) for b in (b1, b2, b3))

    cost = pl.CostEstimate(
        flops=2 * M_pad * (K1 * C1 + C1 * C2 + C2 * C3),
        transcendentals=M_pad * (C1 + C2),
        bytes_accessed=(p_bf.size * 2
                        + w1b.size * 2 + (w2f.size + w3f.size) * 4
                        + (C1 + C2 + C3) * 4
                        + C3 * M_pad * jnp.dtype(out_dtype).itemsize),
    )

    out = pl.pallas_call(
        _fused_detector_kernel,
        out_shape=jax.ShapeDtypeStruct((C3, M_pad), out_dtype),
        grid=grid,
        in_specs=[
            pl.BlockSpec((K1, tm), lambda i: (0, i)),   # streamed patches tile
            # Resident weights/biases (constant block index -> DMA'd once).
            # TODO(synk): pipeline_mode=pl.Buffered(1) would drop their double buffer.
            pl.BlockSpec((C1, K1), lambda i: (0, 0)),
            pl.BlockSpec((C1, 1), lambda i: (0, 0)),
            pl.BlockSpec((C2, C1), lambda i: (0, 0)),
            pl.BlockSpec((C2, 1), lambda i: (0, 0)),
            pl.BlockSpec((C3, C2), lambda i: (0, 0)),
            pl.BlockSpec((C3, 1), lambda i: (0, 0)),
        ],
        out_specs=pl.BlockSpec((C3, tm), lambda i: (0, i)),
        compiler_params=pltpu.CompilerParams(
            dimension_semantics=("parallel",),          # megacore shards the M axis
            vmem_limit_bytes=32 * 1024 * 1024,          # v7x-safe; footprint << 1 MiB
        ),
        cost_estimate=cost,
    )(p_bf, w1b, b1c, w2f, b2c, w3f, b3c)
    return out[:, :M]


# ----------------------------------------------------------------------------
# Plain-JAX glue: transposed im2col straight from NCHW, and BN weight folding
# ----------------------------------------------------------------------------
def im2col_nchw_t(x_nchw, kh, kw, stride, padding):
    """NCHW (ideally already bf16) -> (kh*kw*C, B*Ho*Wo); K ordered (kh, kw, cin).

    Only non-minor axes are permuted (Ho, Wo stay innermost) -> cheap on TPU."""
    B, C, H, W = x_nchw.shape
    xp = jnp.pad(x_nchw, ((0, 0), (0, 0), (padding, padding), (padding, padding)))
    Ho = (H + 2 * padding - kh) // stride + 1
    Wo = (W + 2 * padding - kw) // stride + 1
    cols = [xp[:, :, i:i + stride * Ho:stride, j:j + stride * Wo:stride]
            for i in range(kh) for j in range(kw)]
    p = jnp.stack(cols, axis=0)               # (kh*kw, B, C, Ho, Wo)
    p = jnp.transpose(p, (0, 2, 1, 3, 4))     # (kh*kw, C, B, Ho, Wo) — minor dims untouched
    return p.reshape(kh * kw * C, B * Ho * Wo), (B, Ho, Wo)


def conv_weight_t(w_oihw):
    """PyTorch (Cout, Cin, kh, kw) -> (Cout, kh*kw*Cin), matching im2col_nchw_t ordering."""
    Cout, Cin, kh, kw = w_oihw.shape
    return jnp.transpose(w_oihw, (0, 2, 3, 1)).reshape(Cout, kh * kw * Cin)


def fold_bn(gamma, beta, running_mean, running_var, eps=1e-5):
    scale = gamma / jnp.sqrt(running_var + eps)
    bias = beta - running_mean * scale
    return scale, bias


# ----------------------------------------------------------------------------
# Concrete Detector (backbone -> neck -> detector_head)
# ----------------------------------------------------------------------------
class PallasDetector:
    def __init__(self, key, in_ch=4, stem_ch=16, neck_ch=32, num_anchors=3, num_classes=2,
                 out_dtype=jnp.float32):
        # out_dtype=jnp.bfloat16 halves the prediction store (biggest win on v5e);
        # default stays f32 to preserve downstream decode precision.
        self.in_ch, self.stem_ch, self.neck_ch = in_ch, stem_ch, neck_ch
        self.head_ch = num_anchors * (5 + num_classes)  # 21
        self.out_dtype = out_dtype
        ks = jax.random.split(key, 12)
        s = 0.1
        # backbone: ConvNormAct(3x3, stride 2)
        self.bb_w = jax.random.normal(ks[0], (stem_ch, in_ch, 3, 3), jnp.float32) * s
        self.bb_gamma = 1.0 + 0.05 * jax.random.normal(ks[1], (stem_ch,), jnp.float32)
        self.bb_beta = 0.05 * jax.random.normal(ks[2], (stem_ch,), jnp.float32)
        self.bb_mean = 0.05 * jax.random.normal(ks[3], (stem_ch,), jnp.float32)
        self.bb_var = 1.0 + 0.1 * jnp.abs(jax.random.normal(ks[4], (stem_ch,), jnp.float32))
        # neck: ConvNormAct(1x1)
        self.nk_w = jax.random.normal(ks[5], (neck_ch, stem_ch, 1, 1), jnp.float32) * s
        self.nk_gamma = 1.0 + 0.05 * jax.random.normal(ks[6], (neck_ch,), jnp.float32)
        self.nk_beta = 0.05 * jax.random.normal(ks[7], (neck_ch,), jnp.float32)
        self.nk_mean = 0.05 * jax.random.normal(ks[8], (neck_ch,), jnp.float32)
        self.nk_var = 1.0 + 0.1 * jnp.abs(jax.random.normal(ks[9], (neck_ch,), jnp.float32))
        # detector head: plain conv 1x1 with bias
        self.hd_w = jax.random.normal(ks[10], (self.head_ch, neck_ch, 1, 1), jnp.float32) * s
        self.hd_b = 0.05 * jax.random.normal(ks[11], (self.head_ch,), jnp.float32)

    def _inference_params(self):
        """`optimize_for_inference`: fold BatchNorm into the conv weights statically."""
        s1, b1 = fold_bn(self.bb_gamma, self.bb_beta, self.bb_mean, self.bb_var)
        s2, b2 = fold_bn(self.nk_gamma, self.nk_beta, self.nk_mean, self.nk_var)
        w1 = conv_weight_t(self.bb_w) * s1[:, None]     # (16, 36)
        w2 = conv_weight_t(self.nk_w) * s2[:, None]     # (32, 16)
        w3 = conv_weight_t(self.hd_w)                   # (21, 32)
        return w1, b1, w2, b2, w3, self.hd_b

    def forward(self, x_nchw):
        # Cast to bf16 BEFORE im2col so the only HBM intermediate is bf16 end-to-end.
        x = x_nchw.astype(jnp.bfloat16)
        patches_t, (B, Ho, Wo) = im2col_nchw_t(x, 3, 3, stride=2, padding=1)  # (36, M) bf16
        w1, b1, w2, b2, w3, b3 = self._inference_params()
        preds_t = fused_detector_forward(patches_t, w1, b1, w2, b2, w3, b3,
                                         out_dtype=self.out_dtype)            # (21, M)
        preds = jnp.transpose(preds_t.reshape(self.head_ch, B, Ho, Wo), (1, 0, 2, 3))
        return {"predictions": preds}

    def output_shape(self, input_shape):
        N, C, H, W = input_shape
        return {"predictions": (N, self.head_ch, H // 2, W // 2)}

    # TODO(synk): `flop_count_analysis` (FlopCountAnalysis) has no Pallas equivalent;
    # the kernel exposes its cost via pl.CostEstimate instead.


# ----------------------------------------------------------------------------
# Pure-JAX (f32) reference for validation
# ----------------------------------------------------------------------------
def _reference_forward(det, x_nchw):
    def conv(x, w, stride, padding):
        return jax.lax.conv_general_dilated(
            x, w, (stride, stride), [(padding, padding), (padding, padding)],
            dimension_numbers=("NCHW", "OIHW", "NCHW"))

    def silu(v):
        return v * jax.nn.sigmoid(v)

    s, b = fold_bn(det.bb_gamma, det.bb_beta, det.bb_mean, det.bb_var)
    y = silu(conv(x_nchw, det.bb_w, 2, 1) * s[None, :, None, None] + b[None, :, None, None])
    s, b = fold_bn(det.nk_gamma, det.nk_beta, det.nk_mean, det.nk_var)
    y = silu(conv(y, det.nk_w, 1, 0) * s[None, :, None, None] + b[None, :, None, None])
    p = conv(y, det.hd_w, 1, 0) + det.hd_b[None, :, None, None]
    return p


if __name__ == "__main__":
    key = jax.random.PRNGKey(0)
    k_param, k_in = jax.random.split(key)
    det = PallasDetector(k_param, in_ch=4)

    x = jax.random.normal(k_in, (2, 4, 16, 16), jnp.float32)  # NCHW input

    fwd = jax.jit(det.forward)
    out = fwd(x)
    preds = jax.block_until_ready(out["predictions"])
    assert preds.shape == det.output_shape(x.shape)["predictions"], preds.shape

    ref = jax.block_until_ready(_reference_forward(det, x))
    max_err = float(jnp.max(jnp.abs(preds.astype(jnp.float32) - ref)))
    # bf16 patches/backbone weights on the MXU vs f32 reference -> loosened tolerance.
    assert max_err < 2e-2, max_err

    print("KERNEL_OK")
</pallas_src>

<mosaic_0001>
module attributes {stable_mosaic.version = 11 : i64} {
  func.func @_fused_detector_kernel(%arg0: i32, %arg1: memref<36x128xbf16, #tpu.memory_space<vmem>>, %arg2: memref<16x36xbf16, #tpu.memory_space<vmem>>, %arg3: memref<16x1xf32, #tpu.memory_space<vmem>>, %arg4: memref<32x16xf32, #tpu.memory_space<vmem>>, %arg5: memref<32x1xf32, #tpu.memory_space<vmem>>, %arg6: memref<21x32xf32, #tpu.memory_space<vmem>>, %arg7: memref<21x1xf32, #tpu.memory_space<vmem>>, %arg8: memref<21x128xf32, #tpu.memory_space<vmem>>) attributes {dimension_semantics = [#tpu.dimension_semantics<parallel>], iteration_bounds = array<i64: 1>, scalar_prefetch = 0 : i64, scratch_operands = 0 : i64, tpu.core_type = #tpu.core_type<tc>, window_params = [{transform_indices = @transform_0, window_bounds = array<i64: 36, 128>}, {pipeline_mode = #tpu.pipeline_mode<synchronous>, transform_indices = @transform_1, window_bounds = array<i64: 16, 36>}, {pipeline_mode = #tpu.pipeline_mode<synchronous>, transform_indices = @transform_2, window_bounds = array<i64: 16, 1>}, {pipeline_mode = #tpu.pipeline_mode<synchronous>, transform_indices = @transform_3, window_bounds = array<i64: 32, 16>}, {pipeline_mode = #tpu.pipeline_mode<synchronous>, transform_indices = @transform_4, window_bounds = array<i64: 32, 1>}, {pipeline_mode = #tpu.pipeline_mode<synchronous>, transform_indices = @transform_5, window_bounds = array<i64: 21, 32>}, {pipeline_mode = #tpu.pipeline_mode<synchronous>, transform_indices = @transform_6, window_bounds = array<i64: 21, 1>}, {transform_indices = @transform_7, window_bounds = array<i64: 21, 128>}]} {
    %c0 = arith.constant 0 : index
    %c0_0 = arith.constant 0 : index
    %0 = vector.load %arg2[%c0, %c0_0] : memref<16x36xbf16, #tpu.memory_space<vmem>>, vector<16x36xbf16>
    %c0_1 = arith.constant 0 : index
    %c0_2 = arith.constant 0 : index
    %1 = vector.load %arg1[%c0_1, %c0_2] : memref<36x128xbf16, #tpu.memory_space<vmem>>, vector<36x128xbf16>
    %cst = arith.constant dense<0.000000e+00> : vector<16x128xf32>
    %2 = tpu.matmul %0, %1, %cst {dimension_numbers = #tpu.dot_dimension_numbers<[1], [0], [0], [1], [0, 0, 1, 1], [], []>} : vector<16x36xbf16>, vector<36x128xbf16>, vector<16x128xf32> -> vector<16x128xf32>
    %c0_3 = arith.constant 0 : index
    %c0_4 = arith.constant 0 : index
    %3 = vector.load %arg3[%c0_3, %c0_4] : memref<16x1xf32, #tpu.memory_space<vmem>>, vector<16x1xf32>
    %4 = vector.broadcast %3 : vector<16x1xf32> to vector<16x128xf32>
    %5 = arith.addf %2, %4 : vector<16x128xf32>
    %cst_5 = arith.constant 5.000000e-01 : f32
    %6 = vector.broadcast %cst_5 : f32 to vector<16x128xf32>
    %7 = arith.mulf %6, %5 : vector<16x128xf32>
    %8 = math.tanh %7 : vector<16x128xf32>
    %cst_6 = arith.constant 5.000000e-01 : f32
    %9 = vector.broadcast %cst_6 : f32 to vector<16x128xf32>
    %10 = arith.mulf %9, %8 : vector<16x128xf32>
    %cst_7 = arith.constant 5.000000e-01 : f32
    %11 = vector.broadcast %cst_7 : f32 to vector<16x128xf32>
    %12 = arith.addf %10, %11 : vector<16x128xf32>
    %13 = arith.mulf %5, %12 : vector<16x128xf32>
    %c0_8 = arith.constant 0 : index
    %c0_9 = arith.constant 0 : index
    %14 = vector.load %arg4[%c0_8, %c0_9] : memref<32x16xf32, #tpu.memory_space<vmem>>, vector<32x16xf32>
    %cst_10 = arith.constant dense<0.000000e+00> : vector<32x128xf32>
    %15 = tpu.matmul %14, %13, %cst_10 {dimension_numbers = #tpu.dot_dimension_numbers<[1], [0], [0], [1], [0, 0, 1, 1], [], []>} : vector<32x16xf32>, vector<16x128xf32>, vector<32x128xf32> -> vector<32x128xf32>
    %c0_11 = arith.constant 0 : index
    %c0_12 = arith.constant 0 : index
    %16 = vector.load %arg5[%c0_11, %c0_12] : memref<32x1xf32, #tpu.memory_space<vmem>>, vector<32x1xf32>
    %17 = vector.broadcast %16 : vector<32x1xf32> to vector<32x128xf32>
    %18 = arith.addf %15, %17 : vector<32x128xf32>
    %cst_13 = arith.constant 5.000000e-01 : f32
    %19 = vector.broadcast %cst_13 : f32 to vector<32x128xf32>
    %20 = arith.mulf %19, %18 : vector<32x128xf32>
    %21 = math.tanh %20 : vector<32x128xf32>
    %cst_14 = arith.constant 5.000000e-01 : f32
    %22 = vector.broadcast %cst_14 : f32 to vector<32x128xf32>
    %23 = arith.mulf %22, %21 : vector<32x128xf32>
    %cst_15 = arith.constant 5.000000e-01 : f32
    %24 = vector.broadcast %cst_15 : f32 to vector<32x128xf32>
    %25 = arith.addf %23, %24 : vector<32x128xf32>
    %26 = arith.mulf %18, %25 : vector<32x128xf32>
    %c0_16 = arith.constant 0 : index
    %c0_17 = arith.constant 0 : index
    %27 = vector.load %arg6[%c0_16, %c0_17] : memref<21x32xf32, #tpu.memory_space<vmem>>, vector<21x32xf32>
    %cst_18 = arith.constant dense<0.000000e+00> : vector<21x128xf32>
    %28 = tpu.matmul %27, %26, %cst_18 {dimension_numbers = #tpu.dot_dimension_numbers<[1], [0], [0], [1], [0, 0, 1, 1], [], []>} : vector<21x32xf32>, vector<32x128xf32>, vector<21x128xf32> -> vector<21x128xf32>
    %c0_19 = arith.constant 0 : index
    %c0_20 = arith.constant 0 : index
    %29 = vector.load %arg7[%c0_19, %c0_20] : memref<21x1xf32, #tpu.memory_space<vmem>>, vector<21x1xf32>
    %30 = vector.broadcast %29 : vector<21x1xf32> to vector<21x128xf32>
    %31 = arith.addf %28, %30 : vector<21x128xf32>
    %c0_21 = arith.constant 0 : index
    %c0_22 = arith.constant 0 : index
    %32 = vector.load %arg8[%c0_21, %c0_22] : memref<21x128xf32, #tpu.memory_space<vmem>>, vector<21x128xf32>
    tpu.vector_store %arg8[%c0_21, %c0_22], %31 {strides = array<i32>} : memref<21x128xf32, #tpu.memory_space<vmem>>, vector<21x128xf32>,
    return
  }
  func.func @transform_0(%arg0: i32) -> (i32, i32) {
    %c0_i32 = arith.constant 0 : i32
    %c0_i32_0 = arith.constant 0 : i32
    return %c0_i32, %arg0 : i32, i32
  }
  func.func @transform_1(%arg0: i32) -> (i32, i32) {
    %c0_i32 = arith.constant 0 : i32
    %c0_i32_0 = arith.constant 0 : i32
    %c0_i32_1 = arith.constant 0 : i32
    return %c0_i32, %c0_i32_0 : i32, i32
  }
  func.func @transform_2(%arg0: i32) -> (i32, i32) {
    %c0_i32 = arith.constant 0 : i32
    %c0_i32_0 = arith.constant 0 : i32
    %c0_i32_1 = arith.constant 0 : i32
    return %c0_i32, %c0_i32_0 : i32, i32
  }
  func.func @transform_3(%arg0: i32) -> (i32, i32) {
    %c0_i32 = arith.constant 0 : i32
    %c0_i32_0 = arith.constant 0 : i32
    %c0_i32_1 = arith.constant 0 : i32
    return %c0_i32, %c0_i32_0 : i32, i32
  }
  func.func @transform_4(%arg0: i32) -> (i32, i32) {
    %c0_i32 = arith.constant 0 : i32
    %c0_i32_0 = arith.constant 0 : i32
    %c0_i32_1 = arith.constant 0 : i32
    return %c0_i32, %c0_i32_0 : i32, i32
  }
  func.func @transform_5(%arg0: i32) -> (i32, i32) {
    %c0_i32 = arith.constant 0 : i32
    %c0_i32_0 = arith.constant 0 : i32
    %c0_i32_1 = arith.constant 0 : i32
    return %c0_i32, %c0_i32_0 : i32, i32
  }
  func.func @transform_6(%arg0: i32) -> (i32, i32) {
    %c0_i32 = arith.constant 0 : i32
    %c0_i32_0 = arith.constant 0 : i32
    %c0_i32_1 = arith.constant 0 : i32
    return %c0_i32, %c0_i32_0 : i32, i32
  }
  func.func @transform_7(%arg0: i32) -> (i32, i32) {
    %c0_i32 = arith.constant 0 : i32
    %c0_i32_0 = arith.constant 0 : i32
    return %c0_i32, %arg0 : i32, i32
  }
}

</mosaic_0001>

<bundles_post_ra>
// kernel: forward.1
= control target key start
LH: loop header
LB: loop body
LE: loop exit
PB: predicated region body
PF: predicated region fallthrough
CT: control target
= control target key end

     0   :  { %v487_v0 = vmov 0.0   ;;  %vm488_vm0 = vmmov 0   ;;  %v489_v2 = vmov 0   ;;  %vm70_vm1 = vcmask 1041408   ;;  %s615_s0 = inlined_call_operand.vmem [shape: bf16[36,128], index: 0, kind: input, shape index: {}]   ;;  %s616_s2 = inlined_call_operand.vmem [shape: f32[16,1], index: 2, kind: input, shape index: {}]   ;;  %s617_s1 = inlined_call_operand.vmem [shape: bf16[16,36], index: 1, kind: input, shape index: {}]   ;;  %s618_s4 = inlined_call_operand.vmem [shape: f32[32,1], index: 4, kind: input, shape index: {}]   ;;  %s619_s6 = inlined_call_operand.vmem [shape: f32[21,1], index: 6, kind: input, shape index: {}]   ;;  %s620_s3 = inlined_call_operand.vmem [shape: f32[32,16], index: 3, kind: input, shape index: {}]   ;;  %s621_s5 = inlined_call_operand.vmem [shape: f32[21,32], index: 5, kind: input, shape index: {}]   ;;  %s622_s7 = inlined_call_operand.vmem [shape: f32[21,128], index: 7, kind: output, shape index: {}]  }
   0x1   :  { %418 = vmatprep.subr.bf16.mxu0 %v487_v0  ;;  %v471_v1 = vld [vmem:[%s615_s0] sm:$0xff]   ;;  %424 = vmatprep.mubr.msk.bf16.mxu0 %vm488_vm0, %v487_v0  ;;  %v472_v3 = vld [vmem:[%s615_s0 + $0x8] sm:$0xff]   ;;  %v473_v4 = vld [vmem:[%s615_s0 + $0x10] ss:$0 sps:$4 sm:$0x33]   ;;  %vm66_vm2 = vcmask 293888  }
   0x2   :  { %469 = vset.pattern.permute.xlu0 %v489_v2  ;;  %470 = vset.pattern.permute.xlu1 %v489_v2  ;;  %v34_v5 = vld [vmem:[%s616_s2] sm:$0xff]  ;;  %v35_v6 = vld [vmem:[%s616_s2 + $0x8] sm:$0xff]  ;;  %v72_v7 = vsel %vm70_vm1, %v473_v4, 0  ;;  %v131_v9 = vld [vmem:[%s618_s4 + $0x10] sm:$0xff]  ;;  %vm153_vm3 = vcmask 130048   ;;  %v490_v39 = vmov 0.0|0.0  }
   0x3   :  { %419 = vmatpush3.bf16.msra.mxu0 %v471_v1  ;;  %38 = vperm.xlu0 %469, %v34_v5   ;;  %v474_v8 = vld [vmem:[%s617_s1] sm:$0xff]   ;;  %v276_v11 = vld [vmem:[%s619_s6 + $0x10] sm:$0x1f]  ;;  %v130_v14 = vld [vmem:[%s618_s4 + $0x8] sm:$0xff]  ;;  %vm292_vm4 = vcmask 261120  }
   0x4   :  { %420 = vmatprep.subr.bf16.mxu0 %v487_v0  ;;  %v274_v10 = vld [vmem:[%s619_s6] sm:$0xff]  ;;  %v132_v15 = vld [vmem:[%s618_s4 + $0x18] sm:$0xff]  ;;  %v275_v16 = vld [vmem:[%s619_s6 + $0x8] sm:$0xff] }
   0x5   :  { %v125_v12 = vld [vmem:[%s620_s3] sm:$0xff]  ;;  %v126_v36 = vld [vmem:[%s620_s3 + $0x8] sm:$0xff]  ;;  %v127_v37 = vld [vmem:[%s620_s3 + $0x10] sm:$0xff] }
   0x6   :  { %432 = vmatprep.mubr.msk.f32.mxu1 %vm153_vm3, %v125_v12  ;;  %v129_v13 = vld [vmem:[%s618_s4] sm:$0xff]  ;;  %v128_v38 = vld [vmem:[%s620_s3 + $0x18] sm:$0xff]  ;;  %v272_v12 = vld [vmem:[%s621_s5 + $0x8] sm:$0xff] }
   0x7   :  { %421 = vmatpush3.bf16.msra.mxu0 %v472_v3  ;;  %43 = vperm.xlu0 %469, %v35_v6  }
   0x8   :  { %422 = vmatprep.subr.bf16.mxu0 %v487_v0  ;;  %135 = vperm.xlu1 %470, %v129_v13   ;;  %v273_v13 = vld [vmem:[%s621_s5 + $0x10] sm:$0x1f] }
   0xb   :  { %423 = vmatpush3.bf16.msra.mxu0 %v72_v7  ;;  %145 = vperm.xlu0 %469, %v131_v9  }
   0xc   :  { %140 = vperm.xlu1 %470, %v130_v14  }
   0xe   :  { %425 = vmatmul.mubr.msk.bf16.vlgmr.msra.gmra.mrb[0].mxu0 %vm66_vm2, %v474_v8 }
   0xf   :  { %279 = vperm.xlu0 %469, %v274_v10  }
  0x10   :  { %150 = vperm.xlu1 %470, %v132_v15  }
  0x13   :  { %289 = vperm.xlu0 %469, %v276_v11   ;;  %v271_v11 = vld [vmem:[%s621_s5] sm:$0xff] }
  0x14   :  { %284 = vperm.xlu1 %470, %v275_v16  }
  0x82   :  { %v39_v17 = vpop.permute.xlu0 %38 }
  0x86   :  { %v44_v21 = vpop.permute.xlu0 %43 }
  0x87   :  { %v136_v40 = vpop.permute.xlu1 %135 }
  0x8a   :  { %v146_v50 = vpop.permute.xlu0 %145 }
  0x8b   :  { %v141_v41 = vpop.permute.xlu1 %140 }
  0x8e   :  { %v280_v14 = vpop.permute.xlu0 %279 }
  0x8f   :  { %v151_v47 = vpop.permute.xlu1 %150 }
  0xe1   :  { %v108_v18 = vpop.f32.mrb[0].mxu0 }
  0xe2   :  { %v109_v19 = vadd.f32 %v108_v18, %v39_v17  ;;  %v426_v20 = vpop.f32.mrb[1].mxu0  ;;  %v285_v18 = vpop.permute.xlu1 %284 }
  0xe3   :  { %v111_v22 = vpop.f32.mrb[2].mxu0 }
  0xe4   :  { %v115_v23 = vmul.f32 0.5, %v109_v19  ;;  %v112_v24 = vadd.f32 %v111_v22, %v44_v21  ;;  %v427_v25 = vpop.f32.mrb[3].mxu0 }
  0xe6   :  { %475 = vtanh.f32 %v115_v23  ;;  %v116_v26 = vmul.f32 0.5, %v112_v24 }
  0xe8   :  { %477 = vtanh.f32 %v116_v26 }
  0xf0   :  { %v476_v27 = vpop.eup %475 }
  0xf1   :  { %v119_v28 = vmul.f32 0.5, %v476_v27 }
  0xf2   :  { %v478_v29 = vpop.eup %477 }
  0xf3   :  { %v121_v30 = vadd.f32 0.5, %v119_v28  ;;  %v120_v31 = vmul.f32 0.5, %v478_v29 }
  0xf5   :  { %v122_v32 = vadd.f32 0.5, %v120_v31  ;;  %v123_v33 = vmul.f32 %v121_v30, %v109_v19 }
  0xf7   :  { %v124_v34 = vmul.f32 %v122_v32, %v112_v24 }
  0xf9   :  { %v455_v35 = vpack.c.bf16 %v124_v34, %v123_v33 }
  0xfb   :  { %456 = vmatprep.subr.bf16.mxu1 %v455_v35 }
  0xfc   :  { %458 = vmatpush3.bf16.msra.mxu1 %v455_v35 }
  0xfd   :  { %459 = vmatprep.subr.bf16.mxu1 %v490_v39 }
  0xff   :  { %433 = vmatmul.mubr.msk.f32.vlgmr.msra.gmra.mrb[0].mxu1 %vm153_vm3, %v126_v36 }
 0x100   :  { %435 = vmatprep.mubr.msk.f32.mxu1 %vm153_vm3, %v127_v37 }
 0x103   :  { %436 = vmatmul.mubr.msk.f32.gmra.mrb[2].mxu1 %vm153_vm3, %v128_v38 }
 0x104   :  { %446 = vmatprep.mubr.msk.f32.mxu1 %vm488_vm0, %v487_v0 }
 0x1d2   :  { %v434_v42 = vpop.f32.mrb[0].mxu1 }
 0x1d3   :  { %v238_v43 = vadd.f32 %v434_v42, %v141_v41  ;;  %v232_v44 = vpop.f32.mrb[1].mxu1 }
 0x1d4   :  { %v233_v45 = vadd.f32 %v232_v44, %v136_v40 }
 0x1d5   :  { %v252_v46 = vmul.f32 0.5, %v238_v43 }
 0x1d6   :  { %v251_v48 = vmul.f32 0.5, %v233_v45  ;;  %v437_v49 = vpop.f32.mrb[2].mxu1 }
 0x1d7   :  { %479 = vtanh.f32 %v252_v46  ;;  %v248_v51 = vadd.f32 %v437_v49, %v151_v47  ;;  %v242_v52 = vpop.f32.mrb[3].mxu1 }
 0x1d8   :  { %481 = vtanh.f32 %v251_v48  ;;  %v243_v53 = vadd.f32 %v242_v52, %v146_v50 }
 0x1d9   :  { %v254_v54 = vmul.f32 0.5, %v248_v51 }
 0x1da   :  { %v253_v55 = vmul.f32 0.5, %v243_v53 }
 0x1db   :  { %483 = vtanh.f32 %v254_v54 }
 0x1dc   :  { %485 = vtanh.f32 %v253_v55 }
 0x1e1   :  { %v480_v56 = vpop.eup %479 }
 0x1e2   :  { %v482_v57 = vpop.eup %481  ;;  %v260_v58 = vmul.f32 0.5, %v480_v56 }
 0x1e3   :  { %v259_v59 = vmul.f32 0.5, %v482_v57 }
 0x1e4   :  { %v264_v60 = vadd.f32 0.5, %v260_v58 }
 0x1e5   :  { %v484_v61 = vpop.eup %483  ;;  %v263_v62 = vadd.f32 0.5, %v259_v59 }
 0x1e6   :  { %v486_v63 = vpop.eup %485  ;;  %v268_v1 = vmul.f32 %v264_v60, %v238_v43  ;;  %v262_v2 = vmul.f32 0.5, %v484_v61 }
 0x1e7   :  { %v267_v3 = vmul.f32 %v263_v62, %v233_v45  ;;  %v261_v4 = vmul.f32 0.5, %v486_v63 }
 0x1e8   :  { %v266_v5 = vadd.f32 0.5, %v262_v2 }
 0x1e9   :  { %v460_v6 = vpack.c.bf16 %v268_v1, %v267_v3  ;;  %v265_v7 = vadd.f32 0.5, %v261_v4 }
 0x1ea   :  { %v270_v8 = vmul.f32 %v266_v5, %v248_v51 }
 0x1eb   :  { %v269_v9 = vmul.f32 %v265_v7, %v243_v53  ;;  %461 = vmatpush3.bf16.msra.mxu1 %v460_v6 }
 0x1ec   :  { %462 = vmatprep.subr.bf16.mxu1 %v490_v39 }
 0x1ed   :  { %v463_v10 = vpack.c.bf16 %v270_v8, %v269_v9 }
 0x1ef   :  { %464 = vmatpush3.bf16.msra.mxu1 %v463_v10 }
 0x1f2   :  { %447 = vmatmul.mubr.msk.f32.vlgmr.msra.gmra.mrb[4].mxu1 %vm292_vm4, %v271_v11 }
 0x1f3   :  { %449 = vmatprep.mubr.msk.f32.mxu1 %vm488_vm0, %v487_v0 }
 0x1f6   :  { %450 = vmatmul.mubr.msk.f32.gmra.mrb[6].mxu1 %vm292_vm4, %v272_v12 }
 0x1f7   :  { %452 = vmatprep.mubr.msk.f32.mxu1 %vm488_vm0, %v487_v0  ;;  %v290_v0 = vpop.permute.xlu0 %289 }
 0x1fa   :  { %453 = vmatmul.mubr.msk.f32.gmra.mrb[8].mxu1 %vm292_vm4, %v273_v13 }
 0x2c5   :  { %v368_v15 = vpop.f32.mrb[4].mxu1 }
 0x2c6   :  { %v369_v16 = vadd.f32 %v368_v15, %v280_v14  ;;  %v448_v17 = vpop.f32.mrb[5].mxu1 }
 0x2c8   :  { %382 = vst [vmem:[%s622_s7] sm:$0xff] %v369_v16 }
 0x2c9   :  { %v373_v19 = vpop.f32.mrb[6].mxu1 }
 0x2ca   :  { %v374_v20 = vadd.f32 %v373_v19, %v285_v18  ;;  %v451_v21 = vpop.f32.mrb[7].mxu1 }
 0x2cc   :  { %383 = vst [vmem:[%s622_s7 + $0x8] sm:$0xff] %v374_v20 }
 0x2cd   :  { %v378_v22 = vpop.f32.mrb[8].mxu1 }
 0x2ce   :  { %v379_v23 = vadd.f32 %v378_v22, %v290_v0  ;;  %v454_v24 = vpop.f32.mrb[9].mxu1 }
 0x2d0   :  { %384 = vst [vmem:[%s622_s7 + $0x10] sm:$0x1f] %v379_v23 }

</bundles_post_ra>
